<compile_context>
chip_gen: v7x
topology: tpu7x:2x2x1
jax: 0.10.0
libtpu: 0.0.40
codegen_flags: <defaults>
</compile_context>

<pallas_src>
import jax
import jax.numpy as jnp
from jax.experimental import pallas as pl
from jax.experimental.pallas import tpu as pltpu

H1, H2, H3 = 64, 32, 1


def heartnet_kernel(xT_ref, w1_ref, b1_ref, w2_ref, b2_ref, w3_ref, b3_ref, o_ref):
    """Fused MLP forward in transposed (batch-on-lanes) form.

    xT_ref : [F,  TB]   (f32 or bf16)
    w*_ref : [out, in]  (f32 or bf16)      b*_ref : [out, 1]  f32
    o_ref  : [1,  TB]   f32 probabilities  (lane-dense store)
    """
    xT = xT_ref[...]                                                   # [F, TB]

    # Layer 1: [64, F] @ [F, TB] -> [64, TB]   (MXU, f32 accumulation)
    h1 = jnp.dot(w1_ref[...], xT, preferred_element_type=jnp.float32)
    h1 = jnp.maximum(h1 + b1_ref[...], 0.0)                            # f32 VPU

    # Layer 2: [32, 64] @ [64, TB] -> [32, TB]
    h2 = jnp.dot(w2_ref[...], h1.astype(w2_ref.dtype),
                 preferred_element_type=jnp.float32)
    h2 = jnp.maximum(h2 + b2_ref[...], 0.0)

    # Layer 3: [1, 32] @ [32, TB] -> [1, TB]   (lane-dense final result)
    z = jnp.dot(w3_ref[...], h2.astype(w3_ref.dtype),
                preferred_element_type=jnp.float32)
    o_ref[...] = jax.nn.sigmoid(z + b3_ref[...]).astype(o_ref.dtype)


def heartnet_forward(x, params, *, tile_b=1024, compute_dtype=jnp.bfloat16):
    """x: [B, F] float32 -> probabilities [B] (matches HeartNet.forward)."""
    w1, b1, w2, b2, w3, b3 = params                 # w: [out, in], b: [out, 1]
    B, F = x.shape
    assert w1.shape == (H1, F), (w1.shape, F)

    # Lane-dense tiles: TILE_B must be a multiple of 128.
    tile_b = max(128, (int(tile_b) + 127) // 128 * 128)
    b_pad = pl.cdiv(B, tile_b) * tile_b
    grid = (b_pad // tile_b,)

    # Layout plumbing outside the kernel: batch on the lane axis, zero-padded.
    xT = jnp.pad(x.T, ((0, 0), (0, b_pad - B))).astype(compute_dtype)  # [F, b_pad]

    w1c, w2c, w3c = (w.astype(compute_dtype) for w in (w1, w2, w3))
    b1f, b2f, b3f = (b.astype(jnp.float32) for b in (b1, b2, b3))

    const = lambda i: (0, 0)
    bytes_per = jnp.dtype(compute_dtype).itemsize
    cost = pl.CostEstimate(
        flops=2 * b_pad * (F * H1 + H1 * H2 + H2 * H3),
        transcendentals=b_pad,                                  # sigmoid exp
        bytes_accessed=(xT.size * bytes_per
                        + (w1.size + w2.size + w3.size) * bytes_per
                        + b_pad * 4),
    )

    out = pl.pallas_call(
        heartnet_kernel,
        out_shape=jax.ShapeDtypeStruct((1, b_pad), jnp.float32),
        grid=grid,
        in_specs=[
            pl.BlockSpec((F, tile_b), lambda i: (0, i)),   # x^T: tiled over batch
            pl.BlockSpec((H1, F), const),                  # w1 (VMEM-resident)
            pl.BlockSpec((H1, 1), const),                  # b1
            pl.BlockSpec((H2, H1), const),                 # w2
            pl.BlockSpec((H2, 1), const),                  # b2
            pl.BlockSpec((H3, H2), const),                 # w3
            pl.BlockSpec((H3, 1), const),                  # b3
        ],
        out_specs=pl.BlockSpec((1, tile_b), lambda i: (0, i)),  # lane-dense out
        compiler_params=pltpu.CompilerParams(
            dimension_semantics=("parallel",),             # megacore on v7x
        ),
        cost_estimate=cost,
    )(xT, w1c, b1f, w2c, b2f, w3c, b3f)

    # nn.Module does .view(-1); also drop the batch padding.
    return out.reshape(-1)[:B]


def init_heartnet_params(key, num_features):
    """PyTorch-style uniform(-1/sqrt(fan_in), +) init; weights stored [out, in]."""
    ks = jax.random.split(key, 6)

    def lin(kw, kb, fan_in, fan_out):
        bound = float(fan_in) ** -0.5
        w = jax.random.uniform(kw, (fan_out, fan_in), jnp.float32, -bound, bound)
        b = jax.random.uniform(kb, (fan_out, 1), jnp.float32, -bound, bound)
        return w, b

    w1, b1 = lin(ks[0], ks[1], num_features, H1)
    w2, b2 = lin(ks[2], ks[3], H1, H2)
    w3, b3 = lin(ks[4], ks[5], H2, H3)
    return (w1, b1, w2, b2, w3, b3)


def heartnet_reference(x, params):
    """Pure-JAX f32 reference for the correctness check."""
    w1, b1, w2, b2, w3, b3 = params
    h1 = jnp.maximum(x @ w1.T + b1.reshape(1, -1), 0.0)
    h2 = jnp.maximum(h1 @ w2.T + b2.reshape(1, -1), 0.0)
    return jax.nn.sigmoid(h2 @ w3.T + b3.reshape(1, -1)).reshape(-1)


if __name__ == "__main__":
    key = jax.random.PRNGKey(0)
    k_x, k_p = jax.random.split(key)

    batch = 300          # not a multiple of the tile -> exercises padding + multi-tile grid
    num_features = 13    # classic heart-disease tabular feature count
    x = jax.random.normal(k_x, (batch, num_features), dtype=jnp.float32)
    params = init_heartnet_params(k_p, num_features)

    ref = heartnet_reference(x, params)

    # f32 path: tight check against the reference.
    out_f32 = jax.block_until_ready(
        heartnet_forward(x, params, tile_b=128, compute_dtype=jnp.float32))
    assert out_f32.shape == (batch,), out_f32.shape
    assert jnp.allclose(out_f32, ref, atol=1e-4, rtol=1e-4), (out_f32, ref)

    # bf16-operand path (halves HBM traffic for x / weights; f32 accumulation).
    out_bf16 = jax.block_until_ready(
        heartnet_forward(x, params, tile_b=128, compute_dtype=jnp.bfloat16))
    assert out_bf16.shape == (batch,), out_bf16.shape
    assert jnp.allclose(out_bf16, ref, atol=2e-2, rtol=2e-2), (out_bf16, ref)

    print("KERNEL_OK")
</pallas_src>

<mosaic_0001>
module attributes {stable_mosaic.version = 11 : i64} {
  func.func @heartnet_kernel(%arg0: i32, %arg1: memref<13x128xf32, #tpu.memory_space<vmem>>, %arg2: memref<64x13xf32, #tpu.memory_space<vmem>>, %arg3: memref<64x1xf32, #tpu.memory_space<vmem>>, %arg4: memref<32x64xf32, #tpu.memory_space<vmem>>, %arg5: memref<32x1xf32, #tpu.memory_space<vmem>>, %arg6: memref<1x32xf32, #tpu.memory_space<vmem>>, %arg7: memref<1x1xf32, #tpu.memory_space<vmem>>, %arg8: memref<1x128xf32, #tpu.memory_space<vmem>>) attributes {dimension_semantics = [#tpu.dimension_semantics<parallel>], iteration_bounds = array<i64: 3>, scalar_prefetch = 0 : i64, scratch_operands = 0 : i64, tpu.core_type = #tpu.core_type<tc>, window_params = [{transform_indices = @transform_0, window_bounds = array<i64: 13, 128>}, {pipeline_mode = #tpu.pipeline_mode<synchronous>, transform_indices = @transform_1, window_bounds = array<i64: 64, 13>}, {pipeline_mode = #tpu.pipeline_mode<synchronous>, transform_indices = @transform_2, window_bounds = array<i64: 64, 1>}, {pipeline_mode = #tpu.pipeline_mode<synchronous>, transform_indices = @transform_3, window_bounds = array<i64: 32, 64>}, {pipeline_mode = #tpu.pipeline_mode<synchronous>, transform_indices = @transform_4, window_bounds = array<i64: 32, 1>}, {pipeline_mode = #tpu.pipeline_mode<synchronous>, transform_indices = @transform_5, window_bounds = array<i64: 1, 32>}, {pipeline_mode = #tpu.pipeline_mode<synchronous>, transform_indices = @transform_6, window_bounds = array<i64: 1, 1>}, {transform_indices = @transform_7, window_bounds = array<i64: 1, 128>}]} {
    %c0 = arith.constant 0 : index
    %c0_0 = arith.constant 0 : index
    %0 = vector.load %arg1[%c0, %c0_0] : memref<13x128xf32, #tpu.memory_space<vmem>>, vector<13x128xf32>
    %c0_1 = arith.constant 0 : index
    %c0_2 = arith.constant 0 : index
    %1 = vector.load %arg2[%c0_1, %c0_2] : memref<64x13xf32, #tpu.memory_space<vmem>>, vector<64x13xf32>
    %cst = arith.constant dense<0.000000e+00> : vector<64x128xf32>
    %2 = tpu.matmul %1, %0, %cst {dimension_numbers = #tpu.dot_dimension_numbers<[1], [0], [0], [1], [0, 0, 1, 1], [], []>} : vector<64x13xf32>, vector<13x128xf32>, vector<64x128xf32> -> vector<64x128xf32>
    %c0_3 = arith.constant 0 : index
    %c0_4 = arith.constant 0 : index
    %3 = vector.load %arg3[%c0_3, %c0_4] : memref<64x1xf32, #tpu.memory_space<vmem>>, vector<64x1xf32>
    %4 = vector.broadcast %3 : vector<64x1xf32> to vector<64x128xf32>
    %5 = arith.addf %2, %4 : vector<64x128xf32>
    %cst_5 = arith.constant 0.000000e+00 : f32
    %6 = vector.broadcast %cst_5 : f32 to vector<64x128xf32>
    %7 = arith.maximumf %5, %6 : vector<64x128xf32>
    %c0_6 = arith.constant 0 : index
    %c0_7 = arith.constant 0 : index
    %8 = vector.load %arg4[%c0_6, %c0_7] : memref<32x64xf32, #tpu.memory_space<vmem>>, vector<32x64xf32>
    %cst_8 = arith.constant dense<0.000000e+00> : vector<32x128xf32>
    %9 = tpu.matmul %8, %7, %cst_8 {dimension_numbers = #tpu.dot_dimension_numbers<[1], [0], [0], [1], [0, 0, 1, 1], [], []>} : vector<32x64xf32>, vector<64x128xf32>, vector<32x128xf32> -> vector<32x128xf32>
    %c0_9 = arith.constant 0 : index
    %c0_10 = arith.constant 0 : index
    %10 = vector.load %arg5[%c0_9, %c0_10] : memref<32x1xf32, #tpu.memory_space<vmem>>, vector<32x1xf32>
    %11 = vector.broadcast %10 : vector<32x1xf32> to vector<32x128xf32>
    %12 = arith.addf %9, %11 : vector<32x128xf32>
    %cst_11 = arith.constant 0.000000e+00 : f32
    %13 = vector.broadcast %cst_11 : f32 to vector<32x128xf32>
    %14 = arith.maximumf %12, %13 : vector<32x128xf32>
    %c0_12 = arith.constant 0 : index
    %c0_13 = arith.constant 0 : index
    %15 = vector.load %arg6[%c0_12, %c0_13] : memref<1x32xf32, #tpu.memory_space<vmem>>, vector<1x32xf32>
    %cst_14 = arith.constant dense<0.000000e+00> : vector<1x128xf32>
    %16 = tpu.matmul %15, %14, %cst_14 {dimension_numbers = #tpu.dot_dimension_numbers<[1], [0], [0], [1], [0, 0, 1, 1], [], []>} : vector<1x32xf32>, vector<32x128xf32>, vector<1x128xf32> -> vector<1x128xf32>
    %c0_15 = arith.constant 0 : index
    %c0_16 = arith.constant 0 : index
    %17 = vector.load %arg7[%c0_15, %c0_16] : memref<1x1xf32, #tpu.memory_space<vmem>>, vector<1x1xf32>
    %18 = vector.broadcast %17 : vector<1x1xf32> to vector<1x128xf32>
    %19 = arith.addf %16, %18 : vector<1x128xf32>
    %20 = arith.negf %19 : vector<1x128xf32>
    %21 = math.exp %20 : vector<1x128xf32>
    %cst_17 = arith.constant 1.000000e+00 : f32
    %22 = vector.broadcast %cst_17 : f32 to vector<1x128xf32>
    %23 = arith.addf %22, %21 : vector<1x128xf32>
    %24 = arith.divf %22, %23 : vector<1x128xf32>
    %c0_18 = arith.constant 0 : index
    %c0_19 = arith.constant 0 : index
    %25 = vector.load %arg8[%c0_18, %c0_19] : memref<1x128xf32, #tpu.memory_space<vmem>>, vector<1x128xf32>
    tpu.vector_store %arg8[%c0_18, %c0_19], %24 {strides = array<i32>} : memref<1x128xf32, #tpu.memory_space<vmem>>, vector<1x128xf32>,
    return
  }
  func.func @transform_0(%arg0: i32) -> (i32, i32) {
    %c0_i32 = arith.constant 0 : i32
    %c0_i32_0 = arith.constant 0 : i32
    return %c0_i32, %arg0 : i32, i32
  }
  func.func @transform_1(%arg0: i32) -> (i32, i32) {
    %c0_i32 = arith.constant 0 : i32
    %c0_i32_0 = arith.constant 0 : i32
    %c0_i32_1 = arith.constant 0 : i32
    return %c0_i32, %c0_i32_0 : i32, i32
  }
  func.func @transform_2(%arg0: i32) -> (i32, i32) {
    %c0_i32 = arith.constant 0 : i32
    %c0_i32_0 = arith.constant 0 : i32
    %c0_i32_1 = arith.constant 0 : i32
    return %c0_i32, %c0_i32_0 : i32, i32
  }
  func.func @transform_3(%arg0: i32) -> (i32, i32) {
    %c0_i32 = arith.constant 0 : i32
    %c0_i32_0 = arith.constant 0 : i32
    %c0_i32_1 = arith.constant 0 : i32
    return %c0_i32, %c0_i32_0 : i32, i32
  }
  func.func @transform_4(%arg0: i32) -> (i32, i32) {
    %c0_i32 = arith.constant 0 : i32
    %c0_i32_0 = arith.constant 0 : i32
    %c0_i32_1 = arith.constant 0 : i32
    return %c0_i32, %c0_i32_0 : i32, i32
  }
  func.func @transform_5(%arg0: i32) -> (i32, i32) {
    %c0_i32 = arith.constant 0 : i32
    %c0_i32_0 = arith.constant 0 : i32
    %c0_i32_1 = arith.constant 0 : i32
    return %c0_i32, %c0_i32_0 : i32, i32
  }
  func.func @transform_6(%arg0: i32) -> (i32, i32) {
    %c0_i32 = arith.constant 0 : i32
    %c0_i32_0 = arith.constant 0 : i32
    %c0_i32_1 = arith.constant 0 : i32
    return %c0_i32, %c0_i32_0 : i32, i32
  }
  func.func @transform_7(%arg0: i32) -> (i32, i32) {
    %c0_i32 = arith.constant 0 : i32
    %c0_i32_0 = arith.constant 0 : i32
    return %c0_i32, %arg0 : i32, i32
  }
}

</mosaic_0001>

<bundles_post_ra>
// kernel: tpu_custom_call.1
= control target key start
LH: loop header
LB: loop body
LE: loop exit
PB: predicated region body
PF: predicated region fallthrough
CT: control target
= control target key end

     0   :  { %s1298_s0 = inlined_call_operand.vmem [shape: f32[13,384], index: 0, kind: input, shape index: {}]   ;;  %s1299_s1 = inlined_call_operand.vmem [shape: f32[64,13], index: 1, kind: input, shape index: {}]   ;;  %s1300_s2 = inlined_call_operand.vmem [shape: f32[64,1], index: 2, kind: input, shape index: {}]   ;;  %s1301_s3 = inlined_call_operand.vmem [shape: f32[32,64], index: 3, kind: input, shape index: {}]   ;;  %s1302_s4 = inlined_call_operand.vmem [shape: f32[32,1], index: 4, kind: input, shape index: {}]   ;;  %s1303_s5 = inlined_call_operand.vmem [shape: f32[1,32], index: 5, kind: input, shape index: {}]   ;;  %s1304_s6 = inlined_call_operand.<no memory space> [shape: f32[1,1], index: 6, kind: input, shape index: {}]   ;;  %s1305_s7 = inlined_call_operand.hbm [shape: f32[1,384], index: 7, kind: output, shape index: {}]  }
   0x1   :  { %v12_v0 = vstv %s1304_s6 }
   0x2   :  { %13 = vst [vmem:[#allocation2] sm:$0x1] %v12_v0 }
   0x3   :  { %14 = vsyncpa [#allocation5], 0 }
   0x4   :  { %16 = vsyncpa [#allocation5 + $0x1], 0  ;;  %s1104_s26 = smov 0   ;;  %s1106_s27 = smov 0  }
   0x5   :  { %s1108_s28 = smov 0   ;;  %s1110_s29 = smov 0  }
   0x6 LB: > { %s811_s6 = sadd.s32 4294967295, %s1053_s29   ;;  %s812_s30 = sadd.s32 4294967294, %s1053_s29   ;;  %s1053_s29 = sphi %s1110_s29, %s1311_s29   ;;  %s1049_s28 = sphi %s1108_s28, %s1310_s28   ;;  %s1045_s27 = sphi %s1106_s27, %s1309_s27   ;;  %s1041_s26 = sphi %s1104_s26, %s1308_s26  }
   0x7   : > { %s1127_s8 = sadd.s32 1, %s1053_s29   ;;  %s29_s9 = sadd.s32 1, %s1049_s28 }
   0x8   : > { %s26_s10 = ssub.s32 %s1053_s29, %s1127_s8  ;;  %p36_p0 = scmp.ne.s32.totalorder %s1049_s28, %s1045_s27 }
   0x9   : > { %p27_p1 = scmp.eq.s32.totalorder %s26_s10, 0  ;;  %p37_p2 = scmp.eq.s32.totalorder %s1053_s29, 0 }
   0xa   : > { %p192_p3 = scmp.eq.s32.totalorder %s811_s6, 2  ;;  %p197_p4 = scmp.ne.s32.totalorder %s1045_s27, %s1041_s26 }
   0xb   : > { %s1140_s11 = scalar_select %p27_p1, %s1049_s28, %s29_s9  }
   0xc   : > { %p38_p5 = por %p37_p2, %p36_p0  ;;  %p1142_p6 = por %p192_p3, %p36_p0 }
   0xd   : > { %p198_p7 = scmp.eq.s32.totalorder %s812_s30, 2  ;;  %p814_p9 = scmp.ge.s32.totalorder %s1053_s29, 3 }
   0xf   : > { %p1146_p8 = por %p198_p7, %p197_p4  ;;  %232 = sbr.rel (%p814_p9) target bundleno = 29 (0x1d), region = 40 }
  0x16   : > { %235 = sbr.rel (!%p38_p5) target bundleno = 29 (0x1d), region = 44  ;;  %s237_s14 = sand.u32 (%p38_p5), 1, %s1049_s28  }
  0x17   : > { %s816_s15 = sshll.u32 (%p38_p5), %s1053_s29, 3  ;;  %s815_s16 = sshll.u32 (%p38_p5), %s237_s14, 4 }
  0x18   : > { %s241_s19 = scalar_lea.vmem (%p38_p5), %s1298_s0, %s816_s15  ;;  %s239_s20 = scalar_lea.vmem (%p38_p5), [#allocation3], %s815_s16 }
  0x19   : > { %v271_v1 = vld [vmem:[%s241_s19] sm:$0xff] (%p38_p5)  ;;  %v273_v2 = vld [vmem:[%s241_s19 + $0x18] sm:$0xff] (%p38_p5) }
  0x1a   : > { %272 = vst [vmem:[%s239_s20] sm:$0xff] (%p38_p5), %v271_v1  ;;  %274 = vst [vmem:[%s239_s20 + $0x8] sm:$0xff] (%p38_p5), %v273_v2 }
  0x1d PF: > { %p817_p10 = scmp.ge.s32.totalorder %s1053_s29, 1  ;;  %p279_p11 = scmp.lt.s32.totalorder %s1053_s29, 4 }
  0x1f   : > { %p280_p12 = pnand %p817_p10, %p279_p11 }
  0x20   : > { %s1159_s21 = sand.u32 (!%p280_p12), 1, %s1045_s27   ;;  %vm399_vm0 = vcmask (!%p280_p12), 1044480   ;;  %v318_v3 = vld [vmem:[%s1299_s1] sm:$0xff] (!%p280_p12)  ;;  %vm374_vm1 = vcmask (!%p280_p12), 105472   ;;  %v1055_v4 = vmov (!%p280_p12), 0   ;;  %vm1056_vm2 = vmmov (!%p280_p12), 1  }
  0x21   : > { %283 = sbr.rel (%p280_p12) target bundleno = 757 (0x2f5), region = 82  ;;  %s818_s24 = sshll.u32 (!%p280_p12), %s1159_s21, 4  ;;  %868 = vmatprep.mubr.msk.f32.mxu0 (!%p280_p12), %vm374_vm1, %v318_v3  ;;  %985 = vset.pattern.permute.xlu0 (!%p280_p12), %v1055_v4  ;;  %vm914_vm3 = vmpackc.low (!%p280_p12), %vm399_vm0, %vm1056_vm2  ;;  %v326_v8 = vld [vmem:[%s1300_s2] sm:$0xff] (!%p280_p12)  ;;  %v328_v9 = vld [vmem:[%s1300_s2 + $0x10] sm:$0xff] (!%p280_p12)  ;;  %vm544_vm4 = vcmask (!%p280_p12), 523264   ;;  %vm1058_vm5 = vmmov (!%p280_p12), 0  }
  0x22   : > { %986 = vset.pattern.permute.xlu1 (!%p280_p12), %v1055_v4  ;;  %s288_s25 = scalar_lea.vmem (!%p280_p12), [#allocation3], %s818_s24  ;;  %336 = vperm.xlu0 (!%p280_p12), %985, %v326_v8   ;;  %v327_v10 = vld [vmem:[%s1300_s2 + $0x8] sm:$0xff] (!%p280_p12)  ;;  %v329_v11 = vld [vmem:[%s1300_s2 + $0x18] sm:$0xff] (!%p280_p12)  ;;  %v320_v13 = vld [vmem:[%s1299_s1 + $0x10] sm:$0xff] (!%p280_p12)  ;;  %v1057_v4 = vmov (!%p280_p12), 0.0|0.0   ;;  %vm657_vm6 = vcmask (!%p280_p12), 261120  }
  0x23   : > { %v316_v5 = vld [vmem:[%s288_s25] sm:$0xff] (!%p280_p12)  ;;  %v317_v6 = vld [vmem:[%s288_s25 + $0x8] sm:$0x1f] (!%p280_p12)  ;;  %346 = vperm.xlu1 (!%p280_p12), %986, %v328_v9   ;;  %v647_v27 = vld [vmem:[#allocation2] sm:$0x1] (!%p280_p12)  ;;  %s834_s17 = sshll.u32 (!%p280_p12), %s811_s6, 4 }
  0x24   : > { %v913_v7 = vpack.c.bf16 (!%p280_p12), %v317_v6, %v316_v5  ;;  %v319_v12 = vld [vmem:[%s1299_s1 + $0x8] sm:$0xff] (!%p280_p12)  ;;  %v330_v14 = vld [vmem:[%s1300_s2 + $0x20] sm:$0xff] (!%p280_p12)  ;;  %v321_v16 = vld [vmem:[%s1299_s1 + $0x18] sm:$0xff] (!%p280_p12)  ;;  %v1059_v5 = vmov (!%p280_p12), 0.0   ;;  %s315_s18 = scalar_lea.vmem (!%p280_p12), [#allocation4], %s1159_s21  ;;  %s1255_s23 = scalar_lea.hbm (!%p280_p12), %s1305_s7, %s834_s17 }
  0x25   : > { %v331_v15 = vld [vmem:[%s1300_s2 + $0x28] sm:$0xff] (!%p280_p12)  ;;  %v322_v17 = vld [vmem:[%s1299_s1 + $0x20] sm:$0xff] (!%p280_p12)  ;;  %v332_v18 = vld [vmem:[%s1300_s2 + $0x30] sm:$0xff] (!%p280_p12)  ;;  %s751_s19 = sshll.u32 (!%p280_p12), %s315_s18, 4  ;;  %s739_s24 = scalar_lea.sflag (!%p280_p12), [#allocation5], %s1159_s21  ;;  %s1257_s19 = int_to_ptr.vmem [resolvable:$true] %s751_s19 }
  0x26   : > { %915 = vmatprep.subr.msk.bf16.mxu0 (!%p280_p12), %vm914_vm3, %v913_v7  ;;  %341 = vperm.xlu0 (!%p280_p12), %985, %v327_v10   ;;  %v333_v19 = vld [vmem:[%s1300_s2 + $0x38] sm:$0xff] (!%p280_p12)  ;;  %v323_v20 = vld [vmem:[%s1299_s1 + $0x28] sm:$0xff] (!%p280_p12)  ;;  %v324_v21 = vld [vmem:[%s1299_s1 + $0x30] sm:$0xff] (!%p280_p12)  ;;  %s991_s25 = scalar_lea.vmem (!%p280_p12), %s1257_s19, 16  ;;  %s1060_s6 = smov (!%p280_p12), [#allocation4]  }
  0x27   : > { %918 = vmatpush3.bf16.msk.msra.mxu0 (!%p280_p12), %vm914_vm3, %v913_v7  ;;  %351 = vperm.xlu1 (!%p280_p12), %986, %v329_v11   ;;  %v520_v22 = vld [vmem:[%s1302_s4] sm:$0xff] (!%p280_p12)  ;;  %v521_v23 = vld [vmem:[%s1302_s4 + $0x8] sm:$0xff] (!%p280_p12)  ;;  %v325_v24 = vld [vmem:[%s1299_s1 + $0x38] sm:$0xff] (!%p280_p12)  ;;  %p992_p13 = scmp.ne.s32.totalorder (!%p280_p12), %s1257_s19, %s991_s25  ;;  %s995_s30 = sshll.u32 (!%p280_p12), %s1060_s6, 4  ;;  %s996_s30 = int_to_ptr.vmem [resolvable:$false] %s995_s30 }
  0x28   : > { %v522_v25 = vld [vmem:[%s1302_s4 + $0x10] sm:$0xff]  ;;  %v523_v26 = vld [vmem:[%s1302_s4 + $0x18] sm:$0xff]  ;;  %v516_v28 = vld [vmem:[%s1301_s3] sm:$0xff]  ;;  %935 = vmatprep.subr.bf16.mxu0 %v1057_v4  ;;  %s997_s9 = scalar_lea.vmem %s996_s30, 32  ;;  %p998_p2 = scmp.lt.s32.totalorder %s1257_s19, %s996_s30 }
  0x29   : > { %896 = vmatprep.mubr.msk.f32.mxu1 %vm544_vm4, %v516_v28  ;;  %v517_v1 = vld [vmem:[%s1301_s3 + $0x8] sm:$0xff]  ;;  %v518_v2 = vld [vmem:[%s1301_s3 + $0x10] sm:$0xff]  ;;  %v519_v3 = vld [vmem:[%s1301_s3 + $0x18] sm:$0xff]  ;;  %p993_p0 = pnand %p992_p13, %p1142_p6  ;;  %p999_p3 = scmp.lt.s32.totalorder %s997_s9, %s991_s25 }
  0x2a   : > { %869 = vmatmul.mubr.msk.f32.vlgmr.msra.gmra.mrb[0].mxu0 %vm374_vm1, %v319_v12  ;;  %356 = vperm.xlu0 %985, %v330_v14  }
  0x2b   : > { %871 = vmatprep.mubr.msk.f32.mxu0 %vm374_vm1, %v320_v13  ;;  %361 = vperm.xlu1 %986, %v331_v15   ;;  %p994_p1 = pneg %p993_p0  ;;  %p1000_p4 = por %p999_p3, %p998_p2 }
  0x2d   : > { %p1001_p5 = pnand %p1000_p4, %p994_p1 }
  0x2e   : > { %872 = vmatmul.mubr.msk.f32.gmra.mrb[2].mxu0 %vm374_vm1, %v321_v16  ;;  %366 = vperm.xlu0 %985, %v332_v18  }
  0x2f   : > { %874 = vmatprep.mubr.msk.f32.mxu0 %vm374_vm1, %v322_v17  ;;  %371 = vperm.xlu1 %986, %v333_v19  }
  0x32   : > { %875 = vmatmul.mubr.msk.f32.gmra.mrb[4].mxu0 %vm374_vm1, %v323_v20  ;;  %526 = vperm.xlu0 %985, %v520_v22  }
  0x33   : > { %877 = vmatprep.mubr.msk.f32.mxu0 %vm374_vm1, %v324_v21  ;;  %531 = vperm.xlu1 %986, %v521_v23  }
  0x36   : > { %878 = vmatmul.mubr.msk.f32.gmra.mrb[6].mxu0 %vm374_vm1, %v325_v24  ;;  %536 = vperm.xlu0 %985, %v522_v25   ;;  %v646_v24 = vld [vmem:[%s1303_s5] sm:$0x1]  ;;  %v653_v25 = vlaneseq }
  0x37   : > { %541 = vperm.xlu1 %986, %v523_v26   ;;  %910 = vmatprep.mubr.msk.f32.mxu0 %vm1058_vm5, %v1059_v5 }
  0x38   : > { %v654_v26 = vshrl.u32 %v653_v25, 7 }
  0x3a   : > { %650 = vperm.xlu0 %985, %v647_v27   ;;  %v655_v27 = vsub.s32 0, %v654_v26 }
  0xa1   : > { %v337_v29 = vpop.permute.xlu0 %336 }
  0xa2   : > { %v347_v30 = vpop.permute.xlu1 %346 }
  0xa5   : > { %v342_v31 = vpop.permute.xlu0 %341 }
  0xa6   : > { %v352_v32 = vpop.permute.xlu1 %351 }
  0xa9   : > { %v357_v45 = vpop.permute.xlu0 %356 }
  0xaa   : > { %v362_v42 = vpop.permute.xlu1 %361 }
  0xad   : > { %v367_v57 = vpop.permute.xlu0 %366 }
  0xae   : > { %v372_v54 = vpop.permute.xlu1 %371 }
  0xb1   : > { %v527_v7 = vpop.permute.xlu0 %526 }
  0xb2   : > { %v532_v6 = vpop.permute.xlu1 %531 }
  0xb5   : > { %v537_v16 = vpop.permute.xlu0 %536 }
  0xb6   : > { %v542_v13 = vpop.permute.xlu1 %541 }
  0xb9   : > { %v651_v28 = vpop.permute.xlu0 %650 }
  0xfd   : > { %v870_v33 = vpop.f32.mrb[0].mxu0 }
  0xfe   : > { %v475_v34 = vadd.f32 %v870_v33, %v342_v31  ;;  %v469_v35 = vpop.f32.mrb[1].mxu0 }
  0xff   : > { %v470_v36 = vadd.f32 %v469_v35, %v337_v29  ;;  %v656_v29 = vrot.slane %v651_v28, %v655_v27 }
 0x100   : > { %v509_v37 = vmax.f32 %v475_v34, 0.0 }
 0x101   : > { %v508_v38 = vmax.f32 %v470_v36, 0.0  ;;  %v873_v39 = vpop.f32.mrb[2].mxu0 }
 0x102   : > { %v485_v40 = vadd.f32 %v873_v39, %v352_v32  ;;  %v479_v41 = vpop.f32.mrb[3].mxu0 }
 0x103   : > { %v480_v43 = vadd.f32 %v479_v41, %v347_v30  ;;  %v919_v44 = vpack.c.bf16 %v509_v37, %v508_v38 }
 0x104   : > { %v511_v46 = vmax.f32 %v485_v40, 0.0 }
 0x105   : > { %v510_v47 = vmax.f32 %v480_v43, 0.0  ;;  %v876_v48 = vpop.f32.mrb[4].mxu0  ;;  %920 = vmatprep.subr.bf16.mxu1 %v919_v44 }
 0x106   : > { %v495_v49 = vadd.f32 %v876_v48, %v362_v42  ;;  %v489_v50 = vpop.f32.mrb[5].mxu0  ;;  %922 = vmatpush3.bf16.msra.mxu1 %v919_v44 }
 0x107   : > { %v923_v51 = vpack.c.bf16 %v511_v46, %v510_v47  ;;  %v490_v52 = vadd.f32 %v489_v50, %v357_v45 }
 0x108   : > { %v513_v53 = vmax.f32 %v495_v49, 0.0 }
 0x109   : > { %v512_v55 = vmax.f32 %v490_v52, 0.0  ;;  %v879_v56 = vpop.f32.mrb[6].mxu0  ;;  %924 = vmatprep.subr.bf16.mxu1 %v923_v51 }
 0x10a   : > { %v505_v58 = vadd.f32 %v879_v56, %v372_v54  ;;  %v499_v59 = vpop.f32.mrb[7].mxu0  ;;  %926 = vmatpush3.bf16.msra.mxu1 %v923_v51 }
 0x10b   : > { %v927_v60 = vpack.c.bf16 %v513_v53, %v512_v55  ;;  %v500_v61 = vadd.f32 %v499_v59, %v367_v57 }
 0x10c   : > { %v515_v62 = vmax.f32 %v505_v58, 0.0 }
 0x10d   : > { %v514_v63 = vmax.f32 %v500_v61, 0.0  ;;  %928 = vmatprep.subr.bf16.mxu1 %v927_v60 }
 0x10e   : > { %930 = vmatpush3.bf16.msra.mxu1 %v927_v60 }
 0x10f   : > { %v931_v0 = vpack.c.bf16 %v515_v62, %v514_v63 }
 0x111   : > { %932 = vmatprep.subr.bf16.mxu1 %v931_v0 }
 0x112   : > { %934 = vmatpush3.bf16.msra.mxu1 %v931_v0 }
 0x115   : > { %897 = vmatmul.mubr.msk.f32.vlgmr.msra.gmra.mrb[0].mxu1 %vm544_vm4, %v517_v1 }
 0x116   : > { %899 = vmatprep.mubr.msk.f32.mxu1 %vm544_vm4, %v518_v2 }
 0x119   : > { %900 = vmatmul.mubr.msk.f32.gmra.mrb[2].mxu1 %vm544_vm4, %v519_v3 }
 0x1e8   : > { %v898_v8 = vpop.f32.mrb[0].mxu1 }
 0x1e9   : > { %v629_v9 = vadd.f32 %v898_v8, %v532_v6  ;;  %v623_v10 = vpop.f32.mrb[1].mxu1 }
 0x1ea   : > { %v624_v11 = vadd.f32 %v623_v10, %v527_v7 }
 0x1eb   : > { %v643_v12 = vmax.f32 %v629_v9, 0.0 }
 0x1ec   : > { %v642_v14 = vmax.f32 %v624_v11, 0.0  ;;  %v901_v15 = vpop.f32.mrb[2].mxu1 }
 0x1ed   : > { %v639_v17 = vadd.f32 %v901_v15, %v542_v13  ;;  %v633_v18 = vpop.f32.mrb[3].mxu1 }
 0x1ee   : > { %v936_v19 = vpack.c.bf16 %v643_v12, %v642_v14  ;;  %v634_v20 = vadd.f32 %v633_v18, %v537_v16 }
 0x1ef   : > { %v645_v21 = vmax.f32 %v639_v17, 0.0 }
 0x1f0   : > { %v644_v22 = vmax.f32 %v634_v20, 0.0  ;;  %937 = vmatpush3.bf16.msra.mxu0 %v936_v19 }
 0x1f1   : > { %938 = vmatprep.subr.bf16.mxu0 %v1057_v4 }
 0x1f2   : > { %v939_v23 = vpack.c.bf16 %v645_v21, %v644_v22 }
 0x1f4   : > { %940 = vmatpush3.bf16.msra.mxu0 %v939_v23 }
 0x1f7   : > { %911 = vmatmul.mubr.msk.f32.vlgmr.msra.gmra.mrb[8].mxu0 %vm657_vm6, %v646_v24 }
 0x2ca   : > { %v727_v30 = vpop.f32.mrb[8].mxu0 }
 0x2cb   : > { %v728_v31 = vadd.f32 %v727_v30, %v656_v29  ;;  %v912_v32 = vpop.f32.mrb[9].mxu0 }
 0x2cd   : > { %v833_v33 = vmul.f32 -1.442695, %v728_v31 }
 0x2cf   : > { %987 = vpow2.f32 %v833_v33 }
 0x2d9   : > { %v988_v34 = vpop.eup %987 }
 0x2da   : > { %v734_v35 = vadd.f32 1.0, %v988_v34 }
 0x2dc   : > { %989 = vrcp.f32 %v734_v35 }
 0x2e6   : > { %v990_v36 = vpop.eup %989 }
 0x2e7   : > { %737 = vst [vmem:[%s315_s18] sm:$0x1] %v990_v36 }
 0x2e8   : > { %1004 = shalt.err (!%p1001_p5)
}
 0x2e9   : > { %s1005_s21 = scalar_lea.hbm %s1255_s23, 16  ;;  %s1009_s15 = scalar_lea.hbm %s1305_s7, 48 }
 0x2ea   : > { %p1006_p7 = scmp.ne.s32.totalorder %s1255_s23, %s1005_s21  ;;  %p1010_p11 = scmp.lt.u32.totalorder %s1255_s23, %s1305_s7 }
 0x2eb   : > { %p1011_p12 = scmp.lt.u32.totalorder %s1009_s15, %s1005_s21  ;;  %p1013_p0 = scmp.lt.u32.totalorder %s1005_s21, %s1255_s23 }
 0x2ec   : > { %p1007_p9 = pnand %p1006_p7, %p1142_p6 }
 0x2ed   : > { %p1012_p13 = por %p1011_p12, %p1010_p11 }
 0x2ee   : > { %p1008_p10 = pneg %p1007_p9 }
 0x2ef   : > { %p1014_p1 = por %p1013_p0, %p1012_p13 }
 0x2f1   : > { %p1015_p2 = pnand %p1014_p1, %p1008_p10 }
 0x2f3   : > { %1018 = shalt.err (!%p1015_p2)
}
 0x2f4   : > { %941 = dma.vmem_to_hbm [thread:$0]  (%p1142_p6), %s1257_s19, 16, %s1255_s23, %s739_s24  }
 0x2f5 PF: > { %p947_p3 = scmp.ge.s32.totalorder %s1053_s29, 2  ;;  %s763_s18 = sand.u32 1, %s1041_s26  }
 0x2f6   : > { %s764_s20 = scalar_lea.sflag [#allocation5], %s763_s18 }
 0x2f7   : > { %p944_p4 = pnand %p947_p3, %p1146_p8 }
 0x2f9   : > { %1036 = dma.done.wait (!%p944_p4), %s764_s20, 16  }
 0x2fa   : > { %1038 = vsyncadd (!%p944_p4), %s764_s20, 4294967280  ;;  %p19_p5 = scmp.ge.s32.totalorder %s1127_s8, 5   ;;  %s1308_s26 = smov %s1045_s27 }
 0x2fb   : > { %s1309_s27 = smov %s1049_s28  ;;  %s1310_s28 = smov %s1140_s11 }
 0x2fc   : > { %s1311_s29 = smov %s1127_s8  ;;  %21 = sbr.rel (!%p19_p5) target bundleno = 6 (0x6), region = 126 }
 0x303   :  { %768 = vsyncpa [#allocation5], 1 }
 0x304   :  { %770 = vsyncpa [#allocation5 + $0x1], 1 }

</bundles_post_ra>
